<compile_context>
chip_gen: v7x
topology: tpu7x:2x2x1
jax: 0.10.0
libtpu: 0.0.40
codegen_flags: <defaults>
</compile_context>

<pallas_src>
import numpy as np
import jax
import jax.numpy as jnp
from jax.experimental import pallas as pl
from jax.experimental.pallas import tpu as pltpu


# ----------------------------------------------------------------------------
# Pallas kernel: one grid step per batch of `bsz` surfaces.  Each step emits a
# scalar partial sum of squared errors (upper-triangle semantics recovered via
# the exact-zero-diagonal + 0.5 * full-sum symmetry trick); the wrapper sums
# the partials and divides by the UT element count (MSELoss 'mean').
# ----------------------------------------------------------------------------
def _per_surface_reg_loss_kernel(a_ref, b_ref, tgt_ref, out_ref):
    a = a_ref[...]           # (B, N, 8) f32  rows: [x, y, z, |p|^2, 1, 0, 0, 0]
    b = b_ref[...]           # (B, 8, N) f32  rows: [-2x, -2y, -2z, 1, |p|^2, 0, 0, 0]
    n = a.shape[1]

    # d[b,i,j] = |p_i|^2 + |p_j|^2 - 2<p_i,p_j> = ||p_i - p_j||^2  (one MXU matmul)
    d = jnp.einsum('bik,bkj->bij', a, b, preferred_element_type=jnp.float32)

    # Cancellation guard (d >= 0) + exact-zero diagonal so the symmetry tricks
    # below are exact, not approximate.
    row = jax.lax.broadcasted_iota(jnp.int32, (n, n), 0)
    col = jax.lax.broadcasted_iota(jnp.int32, (n, n), 1)
    d = jnp.where((row == col)[None, :, :], 0.0, jnp.maximum(d, 0.0))

    # Reference: dists -= dists.min(); dists /= dists.max()   (over the UT)
    # UT min is exactly 0 (zero diagonal, d >= 0) -> subtraction skipped.
    # d is symmetric -> UT max == global max (no triangle mask needed).
    d_max = jnp.max(jnp.max(d, axis=2, keepdims=True), axis=1, keepdims=True)  # (B,1,1)
    # Clamp: zero-padded / degenerate surfaces would give 1/0 -> inf -> NaN.
    d_max = jnp.maximum(d_max, jnp.float32(1e-30))
    inv = pl.reciprocal(d_max, approx=False)   # approx=True risks the rtol=1e-5 check
    err = d * inv - tgt_ref[...]               # (B, N, N)

    # err symmetric with exact-zero diagonal -> UT SSE == 0.5 * full-matrix SSE.
    out_ref[...] = 0.5 * jnp.sum(err * err, keepdims=True)    # (1,1,1) partial SSE


# ----------------------------------------------------------------------------
# Wrapper glue
# ----------------------------------------------------------------------------
def _augmented_factors(points):
    """(S,N,3) -> A:(S,N,8), B:(S,8,N) such that A @ B == pairwise sq. distances."""
    x, y, z = points[..., 0], points[..., 1], points[..., 2]
    sq = x * x + y * y + z * z
    one = jnp.ones_like(sq)
    zero = jnp.zeros_like(sq)
    a_aug = jnp.stack([x, y, z, sq, one, zero, zero, zero], axis=-1)               # (S,N,8)
    b_aug = jnp.stack([-2.0 * x, -2.0 * y, -2.0 * z, one, sq, zero, zero, zero],
                      axis=1)                                                      # (S,8,N)
    return a_aug, b_aug


def _round_up(x, m):
    return ((x + m - 1) // m) * m


def _padded_tile_bytes(rows, cols, itemsize=4):
    """VMEM footprint of one f32 (rows, cols) slice after (8,128) tiling."""
    return _round_up(rows, 8) * _round_up(cols, 128) * itemsize


def _vmem_budget_bytes():
    """Generation-aware scoped-VMEM budget: ~75% of physical, capped near 100 MiB."""
    try:
        physical = int(pltpu.get_tpu_info().vmem_capacity_bytes)
    except Exception:
        physical = 64 * 2 ** 20          # conservative fallback (v7x per-TC VMEM)
    return int(min(0.75 * physical, 100 * 2 ** 20))


def _pick_surface_batch(num_surfaces, n, vmem_budget_bytes, max_bsz=128):
    """Largest per-step surface batch that (a) keeps padded, double-buffered
    blocks + intermediates within ~70% of the VMEM budget and (b) leaves the
    grid with >= 2 steps so "parallel" can shard across v7x's 2 TensorCores."""
    per_surface = (
        2 * (_padded_tile_bytes(n, 8)        # A block, double-buffered
             + _padded_tile_bytes(8, n)      # B block, double-buffered
             + _padded_tile_bytes(n, n))     # tgt block, double-buffered
        + 3 * _padded_tile_bytes(n, n))      # d / err / temporaries
    bsz = max(1, int(0.7 * vmem_budget_bytes) // per_surface)
    bsz = min(bsz, max_bsz, num_surfaces)
    if num_surfaces > 1:
        bsz = min(bsz, -(-num_surfaces // 2))   # grid >= 2 (megacore on v7x)
    return max(1, bsz)


def per_surface_reg_loss(new_points, target_mats):
    """new_points: (S, N, 3) f32, target_mats: (S, N, N) f32 -> scalar MSE loss."""
    S, N, _ = new_points.shape
    total = float(S * (N * (N + 1) // 2))       # concatenated UT vector length

    vmem_budget = _vmem_budget_bytes()
    bsz = _pick_surface_batch(S, N, vmem_budget)
    grid = -(-S // bsz)                         # ceil
    s_pad = grid * bsz

    a_aug, b_aug = _augmented_factors(new_points.astype(jnp.float32))
    tgt = target_mats.astype(jnp.float32)
    if s_pad != S:                              # pad awkward S instead of bsz=1 fallback
        pad = s_pad - S
        a_aug = jnp.pad(a_aug, ((0, pad), (0, 0), (0, 0)))
        b_aug = jnp.pad(b_aug, ((0, pad), (0, 0), (0, 0)))
        tgt = jnp.pad(tgt, ((0, pad), (0, 0), (0, 0)))
        # padded surfaces: d == 0, d_max clamped -> err == 0 -> partial SSE == 0

    partials = pl.pallas_call(
        _per_surface_reg_loss_kernel,
        out_shape=jax.ShapeDtypeStruct((grid, 1, 1), jnp.float32),
        grid_spec=pltpu.PrefetchScalarGridSpec(
            num_scalar_prefetch=0,
            grid=(grid,),
            in_specs=[
                pl.BlockSpec((bsz, N, 8), lambda g: (g, 0, 0)),
                pl.BlockSpec((bsz, 8, N), lambda g: (g, 0, 0)),
                pl.BlockSpec((bsz, N, N), lambda g: (g, 0, 0)),
            ],
            out_specs=pl.BlockSpec((1, 1, 1), lambda g: (g, 0, 0)),
        ),
        compiler_params=pltpu.CompilerParams(
            dimension_semantics=("parallel",),   # independent per-block partials
            vmem_limit_bytes=vmem_budget),
    )(a_aug, b_aug, tgt)

    return jnp.sum(partials) / total            # MSELoss(reduction='mean')


# ----------------------------------------------------------------------------
# Plain-JAX glue: the __init__-time buffer (original_distance_matrices, stored
# as full symmetric matrices) and a pure-JAX reference of the forward pass.
# ----------------------------------------------------------------------------
def _normalized_sq_dist_mat(pts):
    """(N, 3) -> (N, N) normalized squared-distance matrix (UT-normalized)."""
    d = jnp.sum((pts[:, None, :] - pts[None, :, :]) ** 2, axis=-1)
    n = pts.shape[0]
    mask = jnp.triu(jnp.ones((n, n), dtype=bool))
    d_min = jnp.min(jnp.where(mask, d, jnp.inf))
    d_sh = d - d_min
    d_max = jnp.max(jnp.where(mask, d_sh, -jnp.inf))
    return d_sh / d_max


def ref_loss(new_points, init_points):
    S, N, _ = new_points.shape
    iu = np.triu_indices(N)
    errs = []
    for s in range(S):
        dn = _normalized_sq_dist_mat(new_points[s])[iu]
        do = _normalized_sq_dist_mat(init_points[s])[iu]
        errs.append((dn - do) ** 2)
    return jnp.mean(jnp.concatenate(errs))


if __name__ == "__main__":
    key = jax.random.PRNGKey(0)
    S, GU, GV = 4, 4, 4          # 4 surfaces, each a 4x4 grid of control points
    N = GU * GV                  # 16 control points per surface (flattened)
    k1, k2 = jax.random.split(key)

    # deterministic "initial" surfaces and "learnt" surfaces
    init_points = jax.random.normal(k1, (S, N, 3), jnp.float32)
    new_points = init_points + 0.1 * jax.random.normal(k2, (S, N, 3), jnp.float32)

    # __init__: precompute original normalized distance matrices (detached buffer)
    target_mats = jax.vmap(_normalized_sq_dist_mat)(init_points)

    loss = per_surface_reg_loss(new_points, target_mats)
    loss = jax.block_until_ready(loss)

    expected = ref_loss(new_points, init_points)
    assert jnp.allclose(loss, expected, rtol=1e-5, atol=1e-6), (loss, expected)
    print("KERNEL_OK")
</pallas_src>

<mosaic_0001>
module attributes {stable_mosaic.version = 11 : i64} {
  func.func @_per_surface_reg_loss_kernel(%arg0: i32, %arg1: memref<2x16x8xf32, #tpu.memory_space<vmem>>, %arg2: memref<2x8x16xf32, #tpu.memory_space<vmem>>, %arg3: memref<2x16x16xf32, #tpu.memory_space<vmem>>, %arg4: memref<1x1x1xf32, #tpu.memory_space<vmem>>) attributes {dimension_semantics = [#tpu.dimension_semantics<parallel>], iteration_bounds = array<i64: 2>, scalar_prefetch = 0 : i64, scratch_operands = 0 : i64, tpu.core_type = #tpu.core_type<tc>, window_params = [{transform_indices = @transform_0, window_bounds = array<i64: 2, 16, 8>}, {transform_indices = @transform_1, window_bounds = array<i64: 2, 8, 16>}, {transform_indices = @transform_2, window_bounds = array<i64: 2, 16, 16>}, {transform_indices = @transform_3, window_bounds = array<i64: 1, 1, 1>}]} {
    %c0 = arith.constant 0 : index
    %c0_0 = arith.constant 0 : index
    %c0_1 = arith.constant 0 : index
    %0 = vector.load %arg1[%c0, %c0_0, %c0_1] : memref<2x16x8xf32, #tpu.memory_space<vmem>>, vector<2x16x8xf32>
    %c0_2 = arith.constant 0 : index
    %c0_3 = arith.constant 0 : index
    %c0_4 = arith.constant 0 : index
    %1 = vector.load %arg2[%c0_2, %c0_3, %c0_4] : memref<2x8x16xf32, #tpu.memory_space<vmem>>, vector<2x8x16xf32>
    "tpu.trace_start"() <{level = 10 : i32, message = "bik,bkj->bij"}> : () -> ()
    %cst = arith.constant dense<0.000000e+00> : vector<2x16x16xf32>
    %2 = tpu.matmul %0, %1, %cst {dimension_numbers = #tpu.dot_dimension_numbers<[2], [1], [1], [2], [0, 0, 0, 1, 1, 2], [0], [0]>} : vector<2x16x8xf32>, vector<2x8x16xf32>, vector<2x16x16xf32> -> vector<2x16x16xf32>
    "tpu.trace_stop"() : () -> ()
    %3 = tpu.iota {dimensions = array<i32: 0>} : vector<16x16xi32>
    %4 = tpu.iota {dimensions = array<i32: 1>} : vector<16x16xi32>
    %5 = arith.cmpi eq, %3, %4 : vector<16x16xi32>
    %6 = vector.shape_cast %5 : vector<16x16xi1> to vector<1x16x16xi1>
    %cst_5 = arith.constant 0.000000e+00 : f32
    %7 = vector.broadcast %cst_5 : f32 to vector<2x16x16xf32>
    %8 = arith.maximumf %2, %7 : vector<2x16x16xf32>
    %cst_6 = arith.constant 0.000000e+00 : f32
    %9 = vector.shape_cast %6 : vector<1x16x16xi1> to vector<1x16x16xi1>
    %10 = vector.broadcast %9 : vector<1x16x16xi1> to vector<2x16x16xi1>
    %11 = vector.broadcast %cst_6 : f32 to vector<2x16x16xf32>
    %12 = arith.select %10, %11, %8 : vector<2x16x16xi1>, vector<2x16x16xf32>
    %cst_7 = arith.constant dense<0xFF800000> : vector<2x16xf32>
    %13 = vector.multi_reduction <maximumf>, %12, %cst_7 [2] : vector<2x16x16xf32> to vector<2x16xf32>
    %14 = vector.shape_cast %13 : vector<2x16xf32> to vector<2x16x1xf32>
    %cst_8 = arith.constant dense<0xFF800000> : vector<2x1xf32>
    %15 = vector.multi_reduction <maximumf>, %14, %cst_8 [1] : vector<2x16x1xf32> to vector<2x1xf32>
    %16 = vector.shape_cast %15 : vector<2x1xf32> to vector<2x1x1xf32>
    %cst_9 = arith.constant 1.000000e-30 : f32
    %17 = vector.broadcast %cst_9 : f32 to vector<2x1x1xf32>
    %18 = arith.maximumf %16, %17 : vector<2x1x1xf32>
    %19 = tpu.reciprocal %18 : vector<2x1x1xf32> -> vector<2x1x1xf32>
    %20 = vector.broadcast %19 : vector<2x1x1xf32> to vector<2x16x16xf32>
    %21 = arith.mulf %12, %20 : vector<2x16x16xf32>
    %c0_10 = arith.constant 0 : index
    %c0_11 = arith.constant 0 : index
    %c0_12 = arith.constant 0 : index
    %22 = vector.load %arg3[%c0_10, %c0_11, %c0_12] : memref<2x16x16xf32, #tpu.memory_space<vmem>>, vector<2x16x16xf32>
    %23 = arith.subf %21, %22 : vector<2x16x16xf32>
    %24 = arith.mulf %23, %23 : vector<2x16x16xf32>
    %25 = vector.shape_cast %24 : vector<2x16x16xf32> to vector<1x2x16x16xf32>
    %cst_13 = arith.constant dense<0.000000e+00> : vector<1xf32>
    %26 = vector.multi_reduction <add>, %25, %cst_13 [1, 2, 3] : vector<1x2x16x16xf32> to vector<1xf32>
    %27 = vector.shape_cast %26 : vector<1xf32> to vector<1x1x1x1xf32>
    %28 = vector.extract %27[0, 0, 0, 0] : f32 from vector<1x1x1x1xf32>
    %29 = vector.broadcast %28 : f32 to vector<1x1x1xf32>
    %cst_14 = arith.constant 5.000000e-01 : f32
    %30 = vector.broadcast %cst_14 : f32 to vector<1x1x1xf32>
    %31 = arith.mulf %30, %29 : vector<1x1x1xf32>
    %c0_15 = arith.constant 0 : index
    %c0_16 = arith.constant 0 : index
    %c0_17 = arith.constant 0 : index
    %32 = vector.load %arg4[%c0_15, %c0_16, %c0_17] : memref<1x1x1xf32, #tpu.memory_space<vmem>>, vector<1x1x1xf32>
    tpu.vector_store %arg4[%c0_15, %c0_16, %c0_17], %31 {strides = array<i32>} : memref<1x1x1xf32, #tpu.memory_space<vmem>>, vector<1x1x1xf32>,
    return
  }
  func.func @transform_0(%arg0: i32) -> (i32, i32, i32) {
    %c0_i32 = arith.constant 0 : i32
    %c0_i32_0 = arith.constant 0 : i32
    %c0_i32_1 = arith.constant 0 : i32
    return %arg0, %c0_i32, %c0_i32_0 : i32, i32, i32
  }
  func.func @transform_1(%arg0: i32) -> (i32, i32, i32) {
    %c0_i32 = arith.constant 0 : i32
    %c0_i32_0 = arith.constant 0 : i32
    %c0_i32_1 = arith.constant 0 : i32
    return %arg0, %c0_i32, %c0_i32_0 : i32, i32, i32
  }
  func.func @transform_2(%arg0: i32) -> (i32, i32, i32) {
    %c0_i32 = arith.constant 0 : i32
    %c0_i32_0 = arith.constant 0 : i32
    %c0_i32_1 = arith.constant 0 : i32
    return %arg0, %c0_i32, %c0_i32_0 : i32, i32, i32
  }
  func.func @transform_3(%arg0: i32) -> (i32, i32, i32) {
    %c0_i32 = arith.constant 0 : i32
    %c0_i32_0 = arith.constant 0 : i32
    %c0_i32_1 = arith.constant 0 : i32
    return %arg0, %c0_i32, %c0_i32_0 : i32, i32, i32
  }
}

</mosaic_0001>

<bundles_post_ra>
// kernel: tpu_custom_call.1
= control target key start
LH: loop header
LB: loop body
LE: loop exit
PB: predicated region body
PF: predicated region fallthrough
CT: control target
= control target key end

     0   :  { %s624_s12 = smov 0   ;;  %s668_s0 = inlined_call_operand.vmem [shape: f32[4,16,8], index: 0, kind: input, shape index: {}]   ;;  %s669_s1 = inlined_call_operand.vmem [shape: f32[4,8,16], index: 1, kind: input, shape index: {}]   ;;  %s670_s2 = inlined_call_operand.vmem [shape: f32[4,16,16], index: 2, kind: input, shape index: {}]   ;;  %s671_s3 = inlined_call_operand.vmem [shape: f32[2,1,1], index: 3, kind: output, shape index: {}]  }
   0x1 LB: > { %s630_s13 = sadd.s32 4294967295, %s602_s12   ;;  %p549_p0 = scmp.ge.s32.totalorder %s602_s12, 1  ;;  %s602_s12 = sphi %s624_s12, %s13_s12  }
   0x2   : > { %p162_p1 = scmp.lt.s32.totalorder %s602_s12, 3 }
   0x4   : > { %p163_p2 = pnand %p549_p0, %p162_p1 }
   0x5   : > { %s550_s14 = sshll.u32 (!%p163_p2), %s630_s13, 1  ;;  %vm225_vm0 = vcmask (!%p163_p2), 64512   ;;  %v388_v6 = vlaneseq (!%p163_p2)  ;;  %vm407_vm2 = vcmask (!%p163_p2), 130048   ;;  %p216_p4 = scmp.lt.s32.totalorder (!%p163_p2), %s630_s13, 1  ;;  %vm472_vm4 = vcmask (!%p163_p2), 0  }
   0x6   : > { %166 = sbr.rel (%p163_p2) target bundleno = 632 (0x278), region = 32  ;;  %p197_p3 = scmp.lt.s32.totalorder (!%p163_p2), %s550_s14, 3 }
   0x7   : > { %v389_v7 = vshrl.u32 (!%p163_p2), %v388_v6, 7  ;;  %v392_v8 = vand.u32 (!%p163_p2), 127, %v388_v6 }
   0x9   : > { %v390_v9 = vadd.s32 (!%p163_p2), 8, %v389_v7  ;;  %vm393_vm1 = vcmp.eq.s32.totalorder (!%p163_p2), %v389_v7, %v392_v8 }
   0xb   : > { %vm394_vm3 = vcmp.eq.s32.totalorder (!%p163_p2), %v390_v9, %v392_v8 }
   0xd   : > { %s673_s14 = smov (!%p197_p3, %s550_s14), 3  ;;  %s675_s13 = smov (!%p216_p4, %s630_s13), 1 }
   0xe   : > { %s554_s15 = sshll.u32 %s673_s14, 3  ;;  %s564_s16 = sshll.u32 %s673_s14, 4 }
   0xf   : > { %s207_s19 = scalar_lea.vmem %s669_s1, %s554_s15  ;;  %s201_s22 = scalar_lea.vmem %s668_s0, %s564_s16 }
  0x10   : > { %v223_v0 = vld [vmem:[%s207_s19] sm:$0xff]  ;;  %v224_v1 = vld [vmem:[%s207_s19 + $0x8] sm:$0xff]  ;;  %v221_v3 = vld [vmem:[%s201_s22 + $0x10] sm:$0xff]  ;;  %s214_s25 = scalar_lea.vmem %s670_s2, %s564_s16  ;;  %s218_s29 = scalar_lea.vmem %s671_s3, %s675_s13 }
  0x11   : > { %v219_v2 = vld [vmem:[%s201_s22] sm:$0xff]  ;;  %572 = vmatprep.subr.mxu0 %v223_v0  ;;  %577 = vmatprep.subr.mxu1 %v224_v1  ;;  %v220_v4 = vld [vmem:[%s201_s22 + $0x8] sm:$0xff]  ;;  %v222_v5 = vld [vmem:[%s201_s22 + $0x18] sm:$0xff] }
  0x12   : > { %573 = vmatpush3.msra.mxu0 %v223_v0  ;;  %574 = vmatprep.mubr.msk.f32.mxu0 %vm225_vm0, %v219_v2  ;;  %v444_v47 = vld [vmem:[%s214_s25 + $0x10] sm:$0xff]  ;;  %v442_v51 = vld [vmem:[%s214_s25] sm:$0xff]  ;;  %v443_v52 = vld [vmem:[%s214_s25 + $0x8] sm:$0xff] }
  0x13   : > { %578 = vmatpush3.msra.mxu1 %v224_v1  ;;  %579 = vmatprep.mubr.msk.f32.mxu1 %vm225_vm0, %v221_v3  ;;  %v445_v53 = vld [vmem:[%s214_s25 + $0x18] sm:$0xff] }
  0x14   : > { %575 = vmatmul.mubr.msk.f32.vlgmr.msra.gmra.mrb[0].mxu0 %vm225_vm0, %v220_v4  ;;  %580 = vmatmul.mubr.msk.f32.vlgmr.msra.gmra.mrb[0].mxu1 %vm225_vm0, %v222_v5 }
  0xe7   : > { %v576_v10 = vpop.f32.mrb[0].mxu0  ;;  %v581_v11 = vpop.f32.mrb[0].mxu1 }
  0xe8   : > { %v298_v12 = vpop.f32.mrb[1].mxu0  ;;  %v379_v13 = vpop.f32.mrb[1].mxu1  ;;  %v396_v14 = vmax.f32 %v576_v10, 0.0  ;;  %v398_v15 = vmax.f32 %v581_v11, 0.0 }
  0xe9   : > { %v395_v16 = vmax.f32 %v298_v12, 0.0  ;;  %v397_v17 = vmax.f32 %v379_v13, 0.0 }
  0xea   : > { %v406_v22 = vsel %vm394_vm3, 0.0, %v398_v15  ;;  %v404_v23 = vsel %vm394_vm3, 0.0, %v396_v14 }
  0xeb   : > { %v405_v18 = vsel %vm393_vm1, 0.0, %v397_v17  ;;  %v403_v19 = vsel %vm393_vm1, 0.0, %v395_v16  ;;  %v417_v24 = vsel %vm407_vm2, %v406_v22, -inf  ;;  %v411_v25 = vsel %vm407_vm2, %v404_v23, -inf }
  0xec   : > { %v414_v20 = vsel %vm407_vm2, %v405_v18, -inf  ;;  %v408_v21 = vsel %vm407_vm2, %v403_v19, -inf }
  0xed   : > { %415 = vmax.xlane.f32.xlu1 %v414_v20  ;;  %409 = vmax.xlane.f32.xlu0 %v408_v21 }
  0xf1   : > { %418 = vmax.xlane.f32.xlu1 %v417_v24  ;;  %412 = vmax.xlane.f32.xlu0 %v411_v25 }
 0x17a   : > { %v416_v26 = vpop.xlane.xlu1 %415  ;;  %v410_v27 = vpop.xlane.xlu0 %409 }
 0x17e   : > { %v419_v28 = vpop.xlane.xlu1 %418  ;;  %v413_v29 = vpop.xlane.xlu0 %412 }
 0x17f   : > { %v427_v30 = vmax.f32 %v416_v26, %v419_v28  ;;  %v420_v31 = vmax.f32 %v410_v27, %v413_v29 }
 0x181   : > { %v428_v32 = vrot.slane %v427_v30, 4  ;;  %v421_v33 = vrot.slane %v420_v31, 4 }
 0x183   : > { %v429_v34 = vmax.f32 %v427_v30, %v428_v32  ;;  %v422_v35 = vmax.f32 %v420_v31, %v421_v33 }
 0x185   : > { %v430_v36 = vrot.slane %v429_v34, 2  ;;  %v423_v37 = vrot.slane %v422_v35, 2 }
 0x187   : > { %v431_v38 = vmax.f32 %v429_v34, %v430_v36  ;;  %v424_v39 = vmax.f32 %v422_v35, %v423_v37 }
 0x189   : > { %v432_v40 = vrot.slane %v431_v38, 1  ;;  %v425_v41 = vrot.slane %v424_v39, 1 }
 0x18b   : > { %v433_v42 = vmax.f32 %v431_v38, %v432_v40  ;;  %v426_v43 = vmax.f32 %v424_v39, %v425_v41 }
 0x18d   : > { %v435_v44 = vmax.f32 %v433_v42, 1e-30  ;;  %v434_v45 = vmax.f32 %v426_v43, 1e-30 }
 0x18f   : > { %592 = vrcp.f32 %v435_v44 }
 0x190   : > { %594 = vrcp.f32 %v434_v45 }
 0x199   : > { %v593_v46 = vpop.eup %592 }
 0x19a   : > { %v595_v48 = vpop.eup %594  ;;  %v440_v49 = vmul.f32 %v593_v46, %v405_v18  ;;  %v441_v50 = vmul.f32 %v593_v46, %v406_v22 }
 0x19b   : > { %v438_v54 = vmul.f32 %v595_v48, %v403_v19  ;;  %v439_v55 = vmul.f32 %v595_v48, %v404_v23 }
 0x19c   : > { %v448_v56 = vsub.f32 %v440_v49, %v444_v47  ;;  %v449_v59 = vsub.f32 %v441_v50, %v445_v53 }
 0x19d   : > { %v446_v57 = vsub.f32 %v438_v54, %v442_v51  ;;  %v447_v58 = vsub.f32 %v439_v55, %v443_v52 }
 0x19e   : > { %v452_v62 = vmul.f32 %v448_v56, %v448_v56  ;;  %v453_v63 = vmul.f32 %v449_v59, %v449_v59 }
 0x19f   : > { %v450_v60 = vmul.f32 %v446_v57, %v446_v57  ;;  %v451_v61 = vmul.f32 %v447_v58, %v447_v58 }
 0x1a0   : > { %v457_v3 = vsel %vm407_vm2, %v452_v62, 0.0  ;;  %v459_v5 = vsel %vm407_vm2, %v453_v63, 0.0 }
 0x1a1   : > { %v454_v0 = vsel %vm407_vm2, %v450_v60, 0.0  ;;  %v455_v1 = vsel %vm407_vm2, %v451_v61, 0.0 }
 0x1a2   : > { %v456_v2 = vadd.f32 %v455_v1, %v454_v0 }
 0x1a4   : > { %v458_v4 = vadd.f32 %v457_v3, %v456_v2 }
 0x1a6   : > { %v460_v6 = vadd.f32 %v459_v5, %v458_v4 }
 0x1a8   : > { %461 = vadd.xlane.f32.xlu0 %v460_v6 }
 0x235   : > { %v462_v7 = vpop.xlane.xlu0 %461 }
 0x236   : > { %v463_v8 = vrot.slane %v462_v7, 4 }
 0x238   : > { %v464_v9 = vadd.f32 %v463_v8, %v462_v7 }
 0x23a   : > { %v465_v10 = vrot.slane %v464_v9, 2 }
 0x23c   : > { %v466_v11 = vadd.f32 %v465_v10, %v464_v9 }
 0x23e   : > { %v467_v12 = vrot.slane %v466_v11, 1 }
 0x240   : > { %v468_v13 = vadd.f32 %v467_v12, %v466_v11 }
 0x242   : > { %582 = vpush %v468_v13 }
 0x273   : > { %s583_s26 = spop %582 }
 0x274   : > { %v470_v14 = vstv %s583_s26 }
 0x275   : > { %v471_v15 = vmul.f32 0.5, %v470_v14 }
 0x277   : > { %473 = vst.msk [vmem:[%s218_s29] sm:$0x1] %vm472_vm4, %v471_v15 }
 0x278 PF: > { %s13_s12 = sadd.s32 1, %s602_s12  }
 0x279   : > { %p10_p5 = scmp.ge.s32.totalorder %s13_s12, 4  }
 0x27b   :  { %12 = sbr.rel (!%p10_p5) target bundleno = 1 (0x1), region = 68 }

</bundles_post_ra>
